<compile_context>
chip_gen: v7x
topology: tpu7x:2x2x1
jax: 0.10.0
libtpu: 0.0.40
codegen_flags: <defaults>
</compile_context>

<pallas_src>
import jax
import jax.numpy as jnp
from jax.experimental import pallas as pl
from jax.experimental.pallas import tpu as pltpu


def se_kernel(x_ref, w1b_ref, w2b_ref, o_ref):
    # x_ref:   (Bt*C, HW)        batch-tile of the input, rows = (b, c) pairs
    # w1b_ref: (Bt*Cr, Bt*C)     block-diag of Bt copies of fc1 weight (f32)
    # w2b_ref: (Bt*C, Bt*Cr)     block-diag of Bt copies of fc2 weight (f32)
    x = x_ref[...]                                              # input dtype

    # Squeeze: mean over the spatial lanes, accumulated in f32 (XLU reduce).
    pooled = jnp.mean(x.astype(jnp.float32), axis=-1, keepdims=True)  # (Bt*C, 1)

    # Excitation: fc1 + ReLU, fc2 + sigmoid — one pair of tiny column mat-vecs
    # for the whole batch tile (weights already transposed/cast host-side).
    h1 = jnp.dot(w1b_ref[...], pooled,
                 preferred_element_type=jnp.float32)            # (Bt*Cr, 1)
    h1 = jnp.maximum(h1, 0.0)
    s = jax.nn.sigmoid(
        jnp.dot(w2b_ref[...], h1,
                preferred_element_type=jnp.float32))            # (Bt*C, 1)

    # Scale: per-row broadcast multiply, kept in the input dtype.
    o_ref[...] = (x * s.astype(x.dtype)).astype(o_ref.dtype)


def _block_diag(w, n):
    """(r, c) -> (n*r, n*c) block-diagonal with n copies of w (built on host)."""
    r, c = w.shape
    eye = jnp.eye(n, dtype=w.dtype)
    return (eye[:, None, :, None] * w[None, :, None, :]).reshape(n * r, n * c)


def _choose_batch_tile(B, C, Cr, HW, itemsize, target_bytes):
    """Largest divisor Bt of B whose (Bt*C, HW) block plus the expanded
    (resident) weights fit the byte budget, keeping the sublane dim (Bt*C) a
    multiple of 8 unless the block covers the full array."""
    best = None
    for cand in range(1, B + 1):
        if B % cand:
            continue
        rows = cand * C
        if cand != B and rows % 8:
            continue
        x_bytes = rows * HW * itemsize
        w_bytes = 2 * (cand * Cr) * (cand * C) * 4      # both block-diag weights, f32
        if x_bytes + w_bytes <= target_bytes:
            best = cand
    if best is None:
        best = B  # fall back to one big block (still correct, just large)
    return best


def se_module(x, w1, w2, *, target_block_bytes=4 * 1024 * 1024):
    """x: (B, C, H, W) NCHW; w1: (C//r, C); w2: (C, C//r). Matches SEModule.forward."""
    B, C, H, W = x.shape
    Cr = w1.shape[0]
    HW = H * W
    itemsize = x.dtype.itemsize

    Bt = _choose_batch_tile(B, C, Cr, HW, itemsize, target_block_bytes)
    num_tiles = B // Bt

    x_flat = x.reshape(B * C, HW)

    # Hoist cast + layout work out of the kernel: block-diagonal, f32 weights
    # let the excitation run as column mat-vecs with no in-kernel .T/.astype.
    w1b = _block_diag(w1.astype(jnp.float32), Bt)   # (Bt*Cr, Bt*C)
    w2b = _block_diag(w2.astype(jnp.float32), Bt)   # (Bt*C, Bt*Cr)

    # Advisory cost: bandwidth-bound elementwise scale + tiny excitation.
    cost = pl.CostEstimate(
        flops=int(B * C * HW + 4 * B * C * Cr),
        transcendentals=int(B * C),
        bytes_accessed=int(2 * B * C * HW * itemsize + (w1b.size + w2b.size) * 4),
    )

    rows_per_block = Bt * C

    out_flat = pl.pallas_call(
        se_kernel,
        out_shape=jax.ShapeDtypeStruct((B * C, HW), x.dtype),
        grid_spec=pltpu.PrefetchScalarGridSpec(
            num_scalar_prefetch=0,
            grid=(num_tiles,),
            in_specs=[
                pl.BlockSpec((rows_per_block, HW), lambda t: (t, 0)),
                pl.BlockSpec(w1b.shape, lambda t: (0, 0)),   # resident weights
                pl.BlockSpec(w2b.shape, lambda t: (0, 0)),   # resident weights
            ],
            out_specs=pl.BlockSpec((rows_per_block, HW), lambda t: (t, 0)),
        ),
        compiler_params=pltpu.CompilerParams(
            dimension_semantics=("parallel",)),
        cost_estimate=cost,
    )(x_flat, w1b, w2b)

    return out_flat.reshape(B, C, H, W)


def reference_se(x, w1, w2):
    # Pure-JAX reference mirroring the PyTorch forward.
    pooled = jnp.mean(x, axis=(2, 3))                       # (B, C)
    h1 = jnp.maximum(pooled @ w1.T, 0.0)                    # (B, Cr)
    s = jax.nn.sigmoid(h1 @ w2.T)                           # (B, C)
    return x * s[:, :, None, None]


if __name__ == "__main__":
    B, C, H, W = 2, 4, 16, 16
    reduction = 2
    Cr = C // reduction

    key = jax.random.PRNGKey(0)
    kx, k1, k2 = jax.random.split(key, 3)

    x = jax.random.normal(kx, (B, C, H, W), dtype=jnp.float32)
    # Deterministic synthetic weights (shapes match nn.Conv2d(.., k=1, bias=False))
    w1 = jax.random.normal(k1, (Cr, C), dtype=jnp.float32) * (1.0 / C) ** 0.5
    w2 = jax.random.normal(k2, (C, Cr), dtype=jnp.float32) * (1.0 / Cr) ** 0.5

    out = jax.block_until_ready(se_module(x, w1, w2))

    ref = reference_se(x, w1, w2)
    assert out.shape == (B, C, H, W)
    assert jnp.allclose(out, ref, atol=1e-5, rtol=1e-5), "mismatch vs reference"

    print("KERNEL_OK")
</pallas_src>

<mosaic_0001>
module attributes {stable_mosaic.version = 11 : i64} {
  func.func @se_kernel(%arg0: i32, %arg1: memref<8x256xf32, #tpu.memory_space<vmem>>, %arg2: memref<4x8xf32, #tpu.memory_space<vmem>>, %arg3: memref<8x4xf32, #tpu.memory_space<vmem>>, %arg4: memref<8x256xf32, #tpu.memory_space<vmem>>) attributes {dimension_semantics = [#tpu.dimension_semantics<parallel>], iteration_bounds = array<i64: 1>, scalar_prefetch = 0 : i64, scratch_operands = 0 : i64, tpu.core_type = #tpu.core_type<tc>, window_params = [{transform_indices = @transform_0, window_bounds = array<i64: 8, 256>}, {pipeline_mode = #tpu.pipeline_mode<synchronous>, transform_indices = @transform_1, window_bounds = array<i64: 4, 8>}, {pipeline_mode = #tpu.pipeline_mode<synchronous>, transform_indices = @transform_2, window_bounds = array<i64: 8, 4>}, {transform_indices = @transform_3, window_bounds = array<i64: 8, 256>}]} {
    %c0 = arith.constant 0 : index
    %c0_0 = arith.constant 0 : index
    %0 = vector.load %arg1[%c0, %c0_0] : memref<8x256xf32, #tpu.memory_space<vmem>>, vector<8x256xf32>
    %cst = arith.constant dense<0.000000e+00> : vector<8xf32>
    %1 = vector.multi_reduction <add>, %0, %cst [1] : vector<8x256xf32> to vector<8xf32>
    %2 = vector.shape_cast %1 : vector<8xf32> to vector<8x1xf32>
    %cst_1 = arith.constant 2.560000e+02 : f32
    %3 = vector.broadcast %cst_1 : f32 to vector<8x1xf32>
    %4 = arith.divf %2, %3 : vector<8x1xf32>
    %c0_2 = arith.constant 0 : index
    %c0_3 = arith.constant 0 : index
    %5 = vector.load %arg2[%c0_2, %c0_3] : memref<4x8xf32, #tpu.memory_space<vmem>>, vector<4x8xf32>
    %cst_4 = arith.constant dense<0.000000e+00> : vector<4x1xf32>
    %6 = tpu.matmul %5, %4, %cst_4 {dimension_numbers = #tpu.dot_dimension_numbers<[1], [0], [0], [1], [0, 0, 1, 1], [], []>} : vector<4x8xf32>, vector<8x1xf32>, vector<4x1xf32> -> vector<4x1xf32>
    %cst_5 = arith.constant 0.000000e+00 : f32
    %7 = vector.broadcast %cst_5 : f32 to vector<4x1xf32>
    %8 = arith.maximumf %6, %7 : vector<4x1xf32>
    %c0_6 = arith.constant 0 : index
    %c0_7 = arith.constant 0 : index
    %9 = vector.load %arg3[%c0_6, %c0_7] : memref<8x4xf32, #tpu.memory_space<vmem>>, vector<8x4xf32>
    %cst_8 = arith.constant dense<0.000000e+00> : vector<8x1xf32>
    %10 = tpu.matmul %9, %8, %cst_8 {dimension_numbers = #tpu.dot_dimension_numbers<[1], [0], [0], [1], [0, 0, 1, 1], [], []>} : vector<8x4xf32>, vector<4x1xf32>, vector<8x1xf32> -> vector<8x1xf32>
    %11 = arith.negf %10 : vector<8x1xf32>
    %12 = math.exp %11 : vector<8x1xf32>
    %cst_9 = arith.constant 1.000000e+00 : f32
    %13 = vector.broadcast %cst_9 : f32 to vector<8x1xf32>
    %14 = arith.addf %13, %12 : vector<8x1xf32>
    %15 = arith.divf %13, %14 : vector<8x1xf32>
    %16 = vector.broadcast %15 : vector<8x1xf32> to vector<8x256xf32>
    %17 = arith.mulf %0, %16 : vector<8x256xf32>
    %c0_10 = arith.constant 0 : index
    %c0_11 = arith.constant 0 : index
    %18 = vector.load %arg4[%c0_10, %c0_11] : memref<8x256xf32, #tpu.memory_space<vmem>>, vector<8x256xf32>
    tpu.vector_store %arg4[%c0_10, %c0_11], %17 {strides = array<i32>} : memref<8x256xf32, #tpu.memory_space<vmem>>, vector<8x256xf32>,
    return
  }
  func.func @transform_0(%arg0: i32) -> (i32, i32) {
    %c0_i32 = arith.constant 0 : i32
    %c0_i32_0 = arith.constant 0 : i32
    return %arg0, %c0_i32 : i32, i32
  }
  func.func @transform_1(%arg0: i32) -> (i32, i32) {
    %c0_i32 = arith.constant 0 : i32
    %c0_i32_0 = arith.constant 0 : i32
    %c0_i32_1 = arith.constant 0 : i32
    return %c0_i32, %c0_i32_0 : i32, i32
  }
  func.func @transform_2(%arg0: i32) -> (i32, i32) {
    %c0_i32 = arith.constant 0 : i32
    %c0_i32_0 = arith.constant 0 : i32
    %c0_i32_1 = arith.constant 0 : i32
    return %c0_i32, %c0_i32_0 : i32, i32
  }
  func.func @transform_3(%arg0: i32) -> (i32, i32) {
    %c0_i32 = arith.constant 0 : i32
    %c0_i32_0 = arith.constant 0 : i32
    return %arg0, %c0_i32 : i32, i32
  }
}

</mosaic_0001>

<bundles_post_ra>
// kernel: tpu_custom_call.1
= control target key start
LH: loop header
LB: loop body
LE: loop exit
PB: predicated region body
PF: predicated region fallthrough
CT: control target
= control target key end

     0   :  { %8 = vsyncpa [#allocation3], 0  ;;  %s350_s0 = inlined_call_operand.hbm [shape: f32[8,256], index: 0, kind: input, shape index: {}]   ;;  %s351_s1 = inlined_call_operand.vmem [shape: f32[4,8], index: 1, kind: input, shape index: {}]   ;;  %s352_s2 = inlined_call_operand.vmem [shape: f32[8,4], index: 2, kind: input, shape index: {}]   ;;  %s353_s3 = inlined_call_operand.hbm [shape: f32[8,256], index: 3, kind: output, shape index: {}]  }
   0x1   :  { %9 = vsyncpa [#allocation4], 0  ;;  %s295_s12 = smov [#allocation2]   ;;  %s247_s16 = scalar_lea.hbm %s350_s0, 256 }
   0x2   :  { %s16_s13 = sshll.u32 %s295_s12, 4  ;;  %p248_p0 = scmp.ne.s32.totalorder %s350_s0, %s247_s16  ;;  %s17_s13 = int_to_ptr.vmem [resolvable:$true] %s16_s13 }
   0x3   :  { %p251_p1 = scmp.lt.u32.totalorder %s247_s16, %s350_s0 }
   0x5   :  { %p253_p2 = pnand %p251_p1, %p248_p0 }
   0x7   :  { %256 = shalt.err (!%p253_p2)
}
   0x8   :  { %s257_s21 = scalar_lea.vmem %s17_s13, 256  ;;  %p262_p4 = scmp.lt.s32.totalorder %s17_s13, %s17_s13 }
   0x9   :  { %p258_p3 = scmp.ne.s32.totalorder %s17_s13, %s257_s21  ;;  %p263_p5 = scmp.lt.s32.totalorder %s257_s21, %s257_s21 }
   0xb   :  { %p264_p6 = por %p263_p5, %p262_p4 }
   0xd   :  { %p265_p7 = pnand %p264_p6, %p258_p3 }
   0xf   :  { %268 = shalt.err (!%p265_p7)
}
  0x10   :  { %19 = dma.hbm_to_vmem [thread:$0]  %s350_s0, 256, %s17_s13, [#allocation3]  }
  0x11   :  { %291 = dma.done.wait [#allocation3], 256  }
  0x12   :  { %292 = vsyncadd [#allocation3], 4294967040  ;;  %v27_v0 = vld [vmem:[#allocation2] sm:$0xff]  ;;  %v28_v1 = vld [vmem:[#allocation2 + $0x8] sm:$0xff]  ;;  %v296_v3 = vmov 0.0   ;;  %vm297_vm0 = vmmov 0  }
  0x13   :  { %v29_v2 = vadd.f32 %v28_v1, %v27_v0  ;;  %227 = vmatprep.subr.mxu0 %v296_v3  ;;  %232 = vmatprep.subr.mxu1 %v296_v3  ;;  %v34_v6 = vld [vmem:[%s351_s1] sm:$0xf]  ;;  %vm35_vm1 = vcmask 64512   ;;  %vm115_vm2 = vcmask 1043456   ;;  %vm111_vm3 = vcmask 31744   ;;  %s299_s1 = smov [#allocation5]  }
  0x14   :  { %229 = vmatprep.mubr.msk.f32.mxu0 %vm297_vm0, %v296_v3  ;;  %234 = vmatprep.mubr.msk.f32.mxu1 %vm297_vm0, %v296_v3  ;;  %v110_v10 = vld [vmem:[%s352_s2] sm:$0xff]  ;;  %v298_v11 = vmov 0   ;;  %s210_s27 = sshll.u32 %s299_s1, 4  ;;  %s211_s27 = int_to_ptr.vmem [resolvable:$true] %s210_s27 }
  0x15   :  { %30 = vadd.xlane.f32.xlu0 %v29_v2  ;;  %s269_s2 = scalar_lea.vmem %s211_s27, 256  ;;  %p274_p9 = scmp.lt.s32.totalorder %s211_s27, %s211_s27 }
  0x16   :  { %242 = vset.pattern.permute.xlu0 %v298_v11  ;;  %p270_p8 = scmp.ne.s32.totalorder %s211_s27, %s269_s2  ;;  %p275_p10 = scmp.lt.s32.totalorder %s269_s2, %s269_s2 }
  0x18   :  { %p276_p11 = por %p275_p10, %p274_p9 }
  0x1a   :  { %p277_p12 = pnand %p276_p11, %p270_p8 }
  0xa2   :  { %v31_v4 = vpop.xlane.xlu0 %30 }
  0xa3   :  { %v33_v5 = vmul.f32 0.00390625, %v31_v4 }
  0xa5   :  { %228 = vmatpush3.msra.mxu0 %v33_v5 }
  0xa6   :  { %230 = vmatmul.mubr.msk.f32.vlgmr.msra.gmra.mrb[0].mxu0 %vm35_vm1, %v34_v6 }
 0x179   :  { %v105_v7 = vpop.f32.mrb[0].mxu0 }
 0x17a   :  { %v109_v8 = vmax.f32 %v105_v7, 0.0  ;;  %v231_v9 = vpop.f32.mrb[1].mxu0 }
 0x17c   :  { %233 = vmatpush3.msk.msra.mxu1 %vm115_vm2, %v109_v8 }
 0x17d   :  { %235 = vmatmul.mubr.msk.f32.vlgmr.msra.gmra.mrb[0].mxu1 %vm111_vm3, %v110_v10 }
 0x250   :  { %v185_v12 = vpop.f32.mrb[0].mxu1 }
 0x251   :  { %v222_v13 = vmul.f32 -1.442695, %v185_v12  ;;  %v236_v14 = vpop.f32.mrb[1].mxu1 }
 0x253   :  { %243 = vpow2.f32 %v222_v13 }
 0x25d   :  { %v244_v15 = vpop.eup %243 }
 0x25e   :  { %v192_v16 = vadd.f32 1.0, %v244_v15 }
 0x260   :  { %245 = vrcp.f32 %v192_v16 }
 0x26a   :  { %v246_v17 = vpop.eup %245 }
 0x26b   :  { %197 = vperm.xlu0 %242, %v246_v17  }
 0x2ea   :  { %v198_v18 = vpop.permute.xlu0 %197 }
 0x2eb   :  { %v200_v19 = vmul.f32 %v198_v18, %v27_v0  ;;  %v201_v20 = vmul.f32 %v198_v18, %v28_v1 }
 0x2ed   :  { %202 = vst [vmem:[#allocation5] sm:$0xff] %v200_v19  ;;  %203 = vst [vmem:[#allocation5 + $0x8] sm:$0xff] %v201_v20 }
 0x2ee   :  { %280 = shalt.err (!%p277_p12)
}
 0x2ef   :  { %s281_s30 = scalar_lea.hbm %s353_s3, 256 }
 0x2f0   :  { %p282_p13 = scmp.ne.s32.totalorder %s353_s3, %s281_s30  ;;  %p285_p0 = scmp.lt.u32.totalorder %s281_s30, %s353_s3 }
 0x2f2   :  { %p287_p1 = pnand %p285_p0, %p282_p13 }
 0x2f4   :  { %290 = shalt.err (!%p287_p1)
}
 0x2f5   :  { %213 = dma.vmem_to_hbm [thread:$0]  %s211_s27, 256, %s353_s3, [#allocation4]  }
 0x2f6   :  { %293 = dma.done.wait [#allocation4], 256  }
 0x2f7   :  { %294 = vsyncadd [#allocation4], 4294967040 }
 0x2f8   :  { %217 = vsyncpa [#allocation3], 1 }
 0x2f9   :  { %218 = vsyncpa [#allocation4], 1 }

</bundles_post_ra>
